<compile_context>
chip_gen: v7x
topology: tpu7x:2x2x1
jax: 0.10.0
libtpu: 0.0.40
codegen_flags: <defaults>
</compile_context>

<pallas_src>
import functools

import jax
import jax.numpy as jnp
from jax.experimental import pallas as pl
from jax.experimental.pallas import tpu as pltpu

EPS = 1e-5
LANE = 128


def _round_up(x, m):
    return ((x + m - 1) // m) * m


def _pick_tile(n_pad):
    for tm in (512, 256, 128):
        if n_pad % tm == 0:
            return tm
    return n_pad


# ----------------------------- fused Pallas kernel ---------------------------

def _fused_forward_kernel(adj_hbm, x_ref, pool_ref, g_ref,
                          wcat_ref, bcat_ref, wrest_ref, brest_ref,
                          out_ref,
                          adj_buf, xb0, xb1, sem,
                          *, num_convs, num_rest, negative_slope, tm, n_pad):
    """Whole forward in one kernel.

    adj_hbm : (n_pad, n_pad) bf16, HBM (streamed in row blocks, double-buffered)
    x_ref   : (n_pad, 128)   bf16, VMEM (resident node features, lanes 0:input_dim real)
    pool    : (b_pad, n_pad) bf16, VMEM (mean-pool matrix)
    g_ref   : (b_pad, 128)   bf16, VMEM (global features, lanes 0:global_dim real)
    wcat    : (num_convs+1, 256, 128) bf16  — [Wl ; Wr] per conv (BN folded) + MLP0 [W_top ; W_bot]
    bcat    : (num_convs+1, 128) f32
    wrest   : (num_rest, 128, 128) bf16     — remaining MLP linears (output padded to 128)
    brest   : (num_rest, 128) f32
    out_ref : (b_pad, 128) f32 (lane-dense; wrapper slices the real columns)
    """
    n_blocks = n_pad // tm
    total_steps = num_convs * n_blocks
    xbufs = (xb0, xb1)

    def leaky(h):
        return jnp.where(h > 0, h, negative_slope * h)

    def adj_copy(step, slot):
        ib = step % n_blocks
        return pltpu.make_async_copy(
            adj_hbm.at[pl.ds(ib * tm, tm), :], adj_buf.at[slot], sem.at[slot])

    # Prime the adjacency-stream pipeline.
    if total_steps > 0:
        adj_copy(0, 0).start()

    # ---- SAGEConv stack (BN folded, dropout = identity) ----
    # Per (layer, row-block) step: wait on the current adj block, prefetch the next,
    # compute agg = adj_blk @ X (f32 acc), then the merged [agg | x_blk] @ [Wl ; Wr].
    for s in range(total_steps):
        layer, ib = divmod(s, n_blocks)
        slot = s % 2
        adj_copy(s, slot).wait()
        if s + 1 < total_steps:
            adj_copy(s + 1, (s + 1) % 2).start()

        cur = x_ref if layer == 0 else xbufs[(layer - 1) % 2]
        nxt = xbufs[layer % 2]

        x_full = cur[...]                                         # (n_pad, 128) bf16
        # NOTE: with d_in <= hidden (16->32, 32->32) adj @ X first is the cheaper order.
        agg = jnp.dot(adj_buf[slot], x_full,
                      preferred_element_type=jnp.float32)          # mean aggregation, f32 acc
        x_blk = cur[pl.ds(ib * tm, tm), :]                         # (tm, 128) bf16
        cat = jnp.concatenate([agg.astype(jnp.bfloat16), x_blk], axis=-1)   # (tm, 256)
        h = jnp.dot(cat, wcat_ref[layer], preferred_element_type=jnp.float32)
        h = h + bcat_ref[pl.ds(layer, 1), :]                       # folded BN bias, f32
        nxt[pl.ds(ib * tm, tm), :] = leaky(h).astype(jnp.bfloat16)

    x_final = x_ref if num_convs == 0 else xbufs[(num_convs - 1) % 2]

    # ---- global mean pool + first MLP linear with the [pooled | global] concat folded in
    pooled = jnp.dot(pool_ref[...], x_final[...], preferred_element_type=jnp.float32)
    cat = jnp.concatenate([pooled.astype(jnp.bfloat16), g_ref[...]], axis=-1)  # (b_pad, 256)
    h = jnp.dot(cat, wcat_ref[num_convs], preferred_element_type=jnp.float32)
    h = leaky(h + bcat_ref[pl.ds(num_convs, 1), :])

    # ---- remaining MLP linears (LeakyReLU on all but the last)
    for j in range(num_rest):
        h = jnp.dot(h.astype(jnp.bfloat16), wrest_ref[j],
                    preferred_element_type=jnp.float32)
        h = h + brest_ref[pl.ds(j, 1), :]
        if j < num_rest - 1:
            h = leaky(h)

    out_ref[...] = h                                               # lane-dense f32 store


def fused_forward(adj, x_pad, pool, g_pad, wcat, bcat, wrest, brest, *,
                  num_convs, num_rest, negative_slope, b_pad, n_pad):
    tm = _pick_tile(n_pad)

    kernel = functools.partial(
        _fused_forward_kernel, num_convs=num_convs, num_rest=num_rest,
        negative_slope=negative_slope, tm=tm, n_pad=n_pad)

    vmem_spec = pl.BlockSpec(memory_space=pltpu.MemorySpace.VMEM)
    operands = (adj, x_pad, pool, g_pad, wcat, bcat, wrest, brest)
    in_specs = [pl.BlockSpec(memory_space=pl.ANY)] + [vmem_spec] * (len(operands) - 1)

    # VMEM budget: resident operands (everything except adj) + adj double buffer
    # + x ping/pong + headroom; capped so the same request is valid on v7x (64 MiB).
    resident = sum(int(a.size) * a.dtype.itemsize for a in operands[1:])
    scratch = 2 * tm * n_pad * 2 + 2 * n_pad * LANE * 2
    vmem_limit = int(min(max(2 * (resident + scratch) + (8 << 20), 16 << 20), 64 << 20))

    return pl.pallas_call(
        kernel,
        out_shape=jax.ShapeDtypeStruct((b_pad, LANE), jnp.float32),
        in_specs=in_specs,
        out_specs=vmem_spec,
        scratch_shapes=[
            pltpu.VMEM((2, tm, n_pad), jnp.bfloat16),   # double-buffered adj row blocks
            pltpu.VMEM((n_pad, LANE), jnp.bfloat16),    # node features ping
            pltpu.VMEM((n_pad, LANE), jnp.bfloat16),    # node features pong
            pltpu.SemaphoreType.DMA((2,)),
        ],
        compiler_params=pltpu.CompilerParams(vmem_limit_bytes=vmem_limit),
    )(*operands)


# --------------------------- parameter construction --------------------------

def kaiming_normal(key, fan_in, fan_out, a):
    # nn.init.kaiming_normal_(nonlinearity='leaky_relu', a=a), fan_in mode;
    # stored as [in, out] so forward is x @ W.
    gain = jnp.sqrt(2.0 / (1.0 + a * a))
    std = gain / jnp.sqrt(float(fan_in))
    return jax.random.normal(key, (fan_in, fan_out), dtype=jnp.float32) * std


def init_params(key, input_dim, hidden_dim, num_layers, output_dim,
                mlp_hidden_dim, mlp_layers, global_dim, negative_slope):
    params = {"convs": [], "bns": [], "mlp": []}
    dims_in = [input_dim] + [hidden_dim] * (num_layers - 1)
    for d_in in dims_in:
        key, k1, k2 = jax.random.split(key, 3)
        params["convs"].append({
            "wl": kaiming_normal(k1, d_in, hidden_dim, negative_slope),
            "wr": kaiming_normal(k2, d_in, hidden_dim, negative_slope),
            "b": jnp.zeros((1, hidden_dim), jnp.float32),
        })
        params["bns"].append({
            "gamma": jnp.ones((1, hidden_dim), jnp.float32),
            "beta": jnp.zeros((1, hidden_dim), jnp.float32),
            "mean": jnp.zeros((1, hidden_dim), jnp.float32),
            "var": jnp.ones((1, hidden_dim), jnp.float32),
        })
    mlp_dims = [hidden_dim + global_dim] + [mlp_hidden_dim] * mlp_layers + [output_dim]
    for d_in, d_out in zip(mlp_dims[:-1], mlp_dims[1:]):
        key, k1 = jax.random.split(key)
        params["mlp"].append({
            "w": kaiming_normal(k1, d_in, d_out, negative_slope),
            "b": jnp.zeros((1, d_out), jnp.float32),
        })
    return params


# ----------------------------- plain-JAX glue (jitted) ------------------------

def build_adjacency(edge_index, num_nodes, n_pad):
    src, dst = edge_index[0], edge_index[1]
    adj = jnp.zeros((n_pad, n_pad), jnp.float32).at[dst, src].add(1.0)
    deg = adj.sum(axis=1, keepdims=True)
    adj = adj / jnp.maximum(deg, 1.0)     # mean over incoming messages; isolated nodes -> 0
    return adj.astype(jnp.bfloat16)


def build_pool(batch, batch_size, num_nodes, b_pad, n_pad):
    onehot = (batch[None, :] == jnp.arange(b_pad)[:, None]).astype(jnp.float32)
    pool = onehot / jnp.maximum(onehot.sum(axis=1, keepdims=True), 1.0)
    pool = jnp.pad(pool, ((0, 0), (0, n_pad - num_nodes)))
    return pool.astype(jnp.bfloat16)


def fold_bn(conv, bn):
    # eval-mode BN folded into the preceding linear: y = (Wx+b - mean)*scale + beta
    scale = bn["gamma"] * jax.lax.rsqrt(bn["var"] + EPS)     # [1, H]
    return {
        "wl": conv["wl"] * scale,
        "wr": conv["wr"] * scale,
        "b": (conv["b"] - bn["mean"]) * scale + bn["beta"],
    }


def _pack_params(conv_folded, mlp_params, hidden_dim, global_dim):
    """Pack all weights into lane-padded bf16 slabs: one [L,256,128] for the
    merged conv / MLP0 matmuls, one [L',128,128] for the remaining MLP linears."""
    wcats, bcats = [], []
    for p in conv_folded:
        d_in = p["wl"].shape[0]
        w = jnp.zeros((2 * LANE, LANE), jnp.float32)
        w = w.at[:d_in, :hidden_dim].set(p["wl"])
        w = w.at[LANE:LANE + d_in, :hidden_dim].set(p["wr"])
        b = jnp.zeros((LANE,), jnp.float32).at[:hidden_dim].set(p["b"][0])
        wcats.append(w)
        bcats.append(b)

    # first MLP linear with the [pooled | global] concat folded in
    w0, b0 = mlp_params[0]["w"], mlp_params[0]["b"]
    d_out0 = w0.shape[1]
    w = jnp.zeros((2 * LANE, LANE), jnp.float32)
    w = w.at[:hidden_dim, :d_out0].set(w0[:hidden_dim])
    w = w.at[LANE:LANE + global_dim, :d_out0].set(w0[hidden_dim:])
    b = jnp.zeros((LANE,), jnp.float32).at[:d_out0].set(b0[0])
    wcats.append(w)
    bcats.append(b)

    wrests, brests = [], []
    for p in mlp_params[1:]:
        d_in, d_out = p["w"].shape
        w = jnp.zeros((LANE, LANE), jnp.float32).at[:d_in, :d_out].set(p["w"])
        b = jnp.zeros((LANE,), jnp.float32).at[:d_out].set(p["b"][0])
        wrests.append(w)
        brests.append(b)
    if not wrests:   # keep a well-formed (unused) operand when there is no tail MLP
        wrests = [jnp.zeros((LANE, LANE), jnp.float32)]
        brests = [jnp.zeros((LANE,), jnp.float32)]

    wcat = jnp.stack(wcats).astype(jnp.bfloat16)
    bcat = jnp.stack(bcats)
    wrest = jnp.stack(wrests).astype(jnp.bfloat16)
    brest = jnp.stack(brests)
    return wcat, bcat, wrest, brest


@functools.partial(jax.jit, static_argnames=("negative_slope", "batch_size"))
def graphsage_forward(params, x, edge_index, batch, global_features, *,
                      negative_slope, batch_size):
    num_nodes, input_dim = x.shape
    hidden_dim = params["convs"][0]["wl"].shape[1]
    global_dim = global_features.shape[1]
    output_dim = params["mlp"][-1]["w"].shape[1]
    assert max(input_dim, hidden_dim, global_dim, output_dim) <= LANE

    n_pad = _round_up(max(num_nodes, LANE), LANE)   # lane-dense adjacency / resident X
    b_pad = _round_up(max(batch_size, 8), 8)        # sublane-aligned batch

    adj = build_adjacency(edge_index, num_nodes, n_pad)                   # bf16
    pool = build_pool(batch, batch_size, num_nodes, b_pad, n_pad)         # bf16

    x_pad = (jnp.zeros((n_pad, LANE), jnp.float32)
             .at[:num_nodes, :input_dim].set(x).astype(jnp.bfloat16))
    g_pad = (jnp.zeros((b_pad, LANE), jnp.float32)
             .at[:batch_size, :global_dim].set(global_features).astype(jnp.bfloat16))

    # fold eval-mode BatchNorm into each conv's weights/bias (inference only)
    conv_folded = [fold_bn(c, b) for c, b in zip(params["convs"], params["bns"])]
    wcat, bcat, wrest, brest = _pack_params(conv_folded, params["mlp"],
                                            hidden_dim, global_dim)

    out = fused_forward(adj, x_pad, pool, g_pad, wcat, bcat, wrest, brest,
                        num_convs=len(conv_folded),
                        num_rest=len(params["mlp"]) - 1,
                        negative_slope=negative_slope,
                        b_pad=b_pad, n_pad=n_pad)
    return out[:batch_size, :output_dim]


# ---------------------------------- main --------------------------------------

if __name__ == "__main__":
    # model hyperparameters
    input_dim = 16
    hidden_dim = 32
    num_layers = 2
    output_dim = 4
    dropout = 0.1            # inference -> identity
    mlp_hidden_dim = 32
    mlp_layers = 2
    global_dim = 8
    negative_slope = 0.042859419676898734

    # synthetic graph batch: 2 graphs x 8 nodes each
    num_nodes = 16
    nodes_per_graph = 8
    batch_size = 2
    num_edges_per_graph = 24

    key = jax.random.PRNGKey(0)
    key, kx, ke0, ke1, kg, kp = jax.random.split(key, 6)

    x = jax.random.normal(kx, (num_nodes, input_dim), dtype=jnp.float32)

    src0 = jax.random.randint(ke0, (num_edges_per_graph,), 0, nodes_per_graph)
    dst0 = jax.random.randint(jax.random.fold_in(ke0, 1), (num_edges_per_graph,), 0, nodes_per_graph)
    src1 = jax.random.randint(ke1, (num_edges_per_graph,), nodes_per_graph, num_nodes)
    dst1 = jax.random.randint(jax.random.fold_in(ke1, 1), (num_edges_per_graph,), nodes_per_graph, num_nodes)
    edge_index = jnp.stack([jnp.concatenate([src0, src1]),
                            jnp.concatenate([dst0, dst1])], axis=0)   # [2, E]

    batch = jnp.repeat(jnp.arange(batch_size), nodes_per_graph)       # [N]
    global_features = jax.random.normal(kg, (batch_size, global_dim), dtype=jnp.float32)

    params = init_params(kp, input_dim, hidden_dim, num_layers, output_dim,
                         mlp_hidden_dim, mlp_layers, global_dim, negative_slope)

    out = graphsage_forward(params, x, edge_index, batch, global_features,
                            negative_slope=negative_slope, batch_size=batch_size)
    out = jax.block_until_ready(out)
    assert out.shape == (batch_size, output_dim), out.shape
    assert jnp.all(jnp.isfinite(out))
    print("KERNEL_OK")
</pallas_src>

<mosaic_0001>
module attributes {stable_mosaic.version = 11 : i64} {
  func.func private @main(%arg0: i32) attributes {dimension_semantics = [#tpu.dimension_semantics<core_parallel>], iteration_bounds = array<i64: 2>, tpu.core_type = #tpu.core_type<sc_scalar_subcore>, window_params = []} {
    return
  }
}

module attributes {stable_mosaic.version = 11 : i64} {
  func.func private @main(%arg0: i32) attributes {dimension_semantics = [#tpu.dimension_semantics<core_parallel>], iteration_bounds = array<i64: 2>, tpu.core_type = #tpu.core_type<sc_scalar_subcore>, window_params = []} {
    return
  }
}

module attributes {stable_mosaic.version = 11 : i64} {
  func.func @_fused_forward_kernel(%arg0: memref<128x128xbf16, #tpu.memory_space<any>>, %arg1: memref<128x128xbf16, #tpu.memory_space<vmem>>, %arg2: memref<8x128xbf16, #tpu.memory_space<vmem>>, %arg3: memref<8x128xbf16, #tpu.memory_space<vmem>>, %arg4: memref<3x256x128xbf16, #tpu.memory_space<vmem>>, %arg5: memref<3x128xf32, #tpu.memory_space<vmem>>, %arg6: memref<2x128x128xbf16, #tpu.memory_space<vmem>>, %arg7: memref<2x128xf32, #tpu.memory_space<vmem>>, %arg8: memref<8x128xf32, #tpu.memory_space<vmem>>, %arg9: memref<2x128x128xbf16, #tpu.memory_space<vmem>>, %arg10: memref<128x128xbf16, #tpu.memory_space<vmem>>, %arg11: memref<128x128xbf16, #tpu.memory_space<vmem>>, %arg12: memref<2x!tpu.dma_semaphore, #tpu.memory_space<semaphore_mem>>) attributes {dimension_semantics = [], scalar_prefetch = 0 : i64, scratch_operands = 4 : i64, tpu.core_type = #tpu.core_type<tc>} {
    %c0_i32 = arith.constant 0 : i32
    %c0_i32_0 = arith.constant 0 : i32
    %c0_i32_1 = arith.constant 0 : i32
    %c0_i32_2 = arith.constant 0 : i32
    %0 = tpu.memref_slice %arg0[%c0_i32_1, %c0_i32_2] : memref<128x128xbf16, #tpu.memory_space<any>> -> memref<128x128xbf16, #tpu.memory_space<any>>
    %c0_i32_3 = arith.constant 0 : i32
    %c0_i32_4 = arith.constant 0 : i32
    %1 = tpu.memref_slice %arg9[%c0_i32, %c0_i32_3, %c0_i32_4] : memref<2x128x128xbf16, #tpu.memory_space<vmem>> -> memref<1x128x128xbf16, #tpu.memory_space<vmem>>
    %2 = tpu.memref_squeeze %1 : memref<1x128x128xbf16, #tpu.memory_space<vmem>> -> memref<128x128xbf16, #tpu.memory_space<vmem>>
    %3 = tpu.memref_slice %arg12[%c0_i32_0] : memref<2x!tpu.dma_semaphore, #tpu.memory_space<semaphore_mem>> -> memref<1x!tpu.dma_semaphore, #tpu.memory_space<semaphore_mem>>
    %4 = tpu.memref_squeeze %3 : memref<1x!tpu.dma_semaphore, #tpu.memory_space<semaphore_mem>> -> memref<!tpu.dma_semaphore, #tpu.memory_space<semaphore_mem>>
    tpu.enqueue_dma source(%0 : memref<128x128xbf16, #tpu.memory_space<any>>) target(%2 : memref<128x128xbf16, #tpu.memory_space<vmem>>) target_semaphore(%4 : memref<!tpu.dma_semaphore, #tpu.memory_space<semaphore_mem>>)
    %c0_i32_5 = arith.constant 0 : i32
    %c0_i32_6 = arith.constant 0 : i32
    %c0_i32_7 = arith.constant 0 : i32
    %c0_i32_8 = arith.constant 0 : i32
    %5 = tpu.memref_slice %arg0[%c0_i32_7, %c0_i32_8] : memref<128x128xbf16, #tpu.memory_space<any>> -> memref<128x128xbf16, #tpu.memory_space<any>>
    %c0_i32_9 = arith.constant 0 : i32
    %c0_i32_10 = arith.constant 0 : i32
    %6 = tpu.memref_slice %arg9[%c0_i32_5, %c0_i32_9, %c0_i32_10] : memref<2x128x128xbf16, #tpu.memory_space<vmem>> -> memref<1x128x128xbf16, #tpu.memory_space<vmem>>
    %7 = tpu.memref_squeeze %6 : memref<1x128x128xbf16, #tpu.memory_space<vmem>> -> memref<128x128xbf16, #tpu.memory_space<vmem>>
    %8 = tpu.memref_slice %arg12[%c0_i32_6] : memref<2x!tpu.dma_semaphore, #tpu.memory_space<semaphore_mem>> -> memref<1x!tpu.dma_semaphore, #tpu.memory_space<semaphore_mem>>
    %9 = tpu.memref_squeeze %8 : memref<1x!tpu.dma_semaphore, #tpu.memory_space<semaphore_mem>> -> memref<!tpu.dma_semaphore, #tpu.memory_space<semaphore_mem>>
    tpu.wait_dma2 semaphore(%9 : memref<!tpu.dma_semaphore, #tpu.memory_space<semaphore_mem>>) src(%5 : memref<128x128xbf16, #tpu.memory_space<any>>) dst(%7 : memref<128x128xbf16, #tpu.memory_space<vmem>>)
    %c1_i32 = arith.constant 1 : i32
    %c1_i32_11 = arith.constant 1 : i32
    %c0_i32_12 = arith.constant 0 : i32
    %c0_i32_13 = arith.constant 0 : i32
    %10 = tpu.memref_slice %arg0[%c0_i32_12, %c0_i32_13] : memref<128x128xbf16, #tpu.memory_space<any>> -> memref<128x128xbf16, #tpu.memory_space<any>>
    %c0_i32_14 = arith.constant 0 : i32
    %c0_i32_15 = arith.constant 0 : i32
    %11 = tpu.memref_slice %arg9[%c1_i32, %c0_i32_14, %c0_i32_15] : memref<2x128x128xbf16, #tpu.memory_space<vmem>> -> memref<1x128x128xbf16, #tpu.memory_space<vmem>>
    %12 = tpu.memref_squeeze %11 : memref<1x128x128xbf16, #tpu.memory_space<vmem>> -> memref<128x128xbf16, #tpu.memory_space<vmem>>
    %13 = tpu.memref_slice %arg12[%c1_i32_11] : memref<2x!tpu.dma_semaphore, #tpu.memory_space<semaphore_mem>> -> memref<1x!tpu.dma_semaphore, #tpu.memory_space<semaphore_mem>>
    %14 = tpu.memref_squeeze %13 : memref<1x!tpu.dma_semaphore, #tpu.memory_space<semaphore_mem>> -> memref<!tpu.dma_semaphore, #tpu.memory_space<semaphore_mem>>
    tpu.enqueue_dma source(%10 : memref<128x128xbf16, #tpu.memory_space<any>>) target(%12 : memref<128x128xbf16, #tpu.memory_space<vmem>>) target_semaphore(%14 : memref<!tpu.dma_semaphore, #tpu.memory_space<semaphore_mem>>)
    %c0 = arith.constant 0 : index
    %c0_16 = arith.constant 0 : index
    %15 = vector.load %arg1[%c0, %c0_16] : memref<128x128xbf16, #tpu.memory_space<vmem>>, vector<128x128xbf16>
    %c0_17 = arith.constant 0 : index
    %c0_18 = arith.constant 0 : index
    %c0_19 = arith.constant 0 : index
    %16 = vector.load %arg9[%c0_17, %c0_18, %c0_19] : memref<2x128x128xbf16, #tpu.memory_space<vmem>>, vector<1x128x128xbf16>
    %17 = vector.shape_cast %16 : vector<1x128x128xbf16> to vector<128x128xbf16>
    %cst = arith.constant dense<0.000000e+00> : vector<128x128xf32>
    %18 = tpu.matmul %17, %15, %cst {dimension_numbers = #tpu.dot_dimension_numbers<[1], [0], [0], [1], [0, 0, 1, 1], [], []>} : vector<128x128xbf16>, vector<128x128xbf16>, vector<128x128xf32> -> vector<128x128xf32>
    %c0_20 = arith.constant 0 : index
    %c0_21 = arith.constant 0 : index
    %19 = vector.load %arg1[%c0_20, %c0_21] : memref<128x128xbf16, #tpu.memory_space<vmem>>, vector<128x128xbf16>
    %20 = arith.truncf %18 : vector<128x128xf32> to vector<128x128xbf16>
    %21 = tpu.concatenate %20, %19 in 1 : vector<128x128xbf16>, vector<128x128xbf16> -> vector<128x256xbf16>
    %c0_22 = arith.constant 0 : index
    %c0_23 = arith.constant 0 : index
    %c0_24 = arith.constant 0 : index
    %22 = vector.load %arg4[%c0_22, %c0_23, %c0_24] : memref<3x256x128xbf16, #tpu.memory_space<vmem>>, vector<1x256x128xbf16>
    %23 = vector.shape_cast %22 : vector<1x256x128xbf16> to vector<256x128xbf16>
    %cst_25 = arith.constant dense<0.000000e+00> : vector<128x128xf32>
    %24 = tpu.matmul %21, %23, %cst_25 {dimension_numbers = #tpu.dot_dimension_numbers<[1], [0], [0], [1], [0, 0, 1, 1], [], []>} : vector<128x256xbf16>, vector<256x128xbf16>, vector<128x128xf32> -> vector<128x128xf32>
    %c0_26 = arith.constant 0 : index
    %c0_27 = arith.constant 0 : index
    %25 = vector.load %arg5[%c0_26, %c0_27] : memref<3x128xf32, #tpu.memory_space<vmem>>, vector<1x128xf32>
    %26 = vector.broadcast %25 : vector<1x128xf32> to vector<128x128xf32>
    %27 = arith.addf %24, %26 : vector<128x128xf32>
    %cst_28 = arith.constant 0.000000e+00 : f32
    %28 = vector.broadcast %cst_28 : f32 to vector<128x128xf32>
    %29 = arith.cmpf ogt, %27, %28 : vector<128x128xf32>
    %cst_29 = arith.constant 0.0428594202 : f32
    %30 = vector.broadcast %cst_29 : f32 to vector<128x128xf32>
    %31 = arith.mulf %30, %27 : vector<128x128xf32>
    %32 = arith.select %29, %27, %31 : vector<128x128xi1>, vector<128x128xf32>
    %33 = arith.truncf %32 : vector<128x128xf32> to vector<128x128xbf16>
    %c0_30 = arith.constant 0 : index
    %c0_31 = arith.constant 0 : index
    %34 = vector.load %arg10[%c0_30, %c0_31] : memref<128x128xbf16, #tpu.memory_space<vmem>>, vector<128x128xbf16>
    tpu.vector_store %arg10[%c0_30, %c0_31], %33 {strides = array<i32>} : memref<128x128xbf16, #tpu.memory_space<vmem>>, vector<128x128xbf16>,
    %c1_i32_32 = arith.constant 1 : i32
    %c1_i32_33 = arith.constant 1 : i32
    %c0_i32_34 = arith.constant 0 : i32
    %c0_i32_35 = arith.constant 0 : i32
    %35 = tpu.memref_slice %arg0[%c0_i32_34, %c0_i32_35] : memref<128x128xbf16, #tpu.memory_space<any>> -> memref<128x128xbf16, #tpu.memory_space<any>>
    %c0_i32_36 = arith.constant 0 : i32
    %c0_i32_37 = arith.constant 0 : i32
    %36 = tpu.memref_slice %arg9[%c1_i32_32, %c0_i32_36, %c0_i32_37] : memref<2x128x128xbf16, #tpu.memory_space<vmem>> -> memref<1x128x128xbf16, #tpu.memory_space<vmem>>
    %37 = tpu.memref_squeeze %36 : memref<1x128x128xbf16, #tpu.memory_space<vmem>> -> memref<128x128xbf16, #tpu.memory_space<vmem>>
    %38 = tpu.memref_slice %arg12[%c1_i32_33] : memref<2x!tpu.dma_semaphore, #tpu.memory_space<semaphore_mem>> -> memref<1x!tpu.dma_semaphore, #tpu.memory_space<semaphore_mem>>
    %39 = tpu.memref_squeeze %38 : memref<1x!tpu.dma_semaphore, #tpu.memory_space<semaphore_mem>> -> memref<!tpu.dma_semaphore, #tpu.memory_space<semaphore_mem>>
    tpu.wait_dma2 semaphore(%39 : memref<!tpu.dma_semaphore, #tpu.memory_space<semaphore_mem>>) src(%35 : memref<128x128xbf16, #tpu.memory_space<any>>) dst(%37 : memref<128x128xbf16, #tpu.memory_space<vmem>>)
    %c0_38 = arith.constant 0 : index
    %c0_39 = arith.constant 0 : index
    %40 = vector.load %arg10[%c0_38, %c0_39] : memref<128x128xbf16, #tpu.memory_space<vmem>>, vector<128x128xbf16>
    %c1 = arith.constant 1 : index
    %c0_40 = arith.constant 0 : index
    %c0_41 = arith.constant 0 : index
    %41 = vector.load %arg9[%c1, %c0_40, %c0_41] : memref<2x128x128xbf16, #tpu.memory_space<vmem>>, vector<1x128x128xbf16>
    %42 = vector.shape_cast %41 : vector<1x128x128xbf16> to vector<128x128xbf16>
    %cst_42 = arith.constant dense<0.000000e+00> : vector<128x128xf32>
    %43 = tpu.matmul %42, %40, %cst_42 {dimension_numbers = #tpu.dot_dimension_numbers<[1], [0], [0], [1], [0, 0, 1, 1], [], []>} : vector<128x128xbf16>, vector<128x128xbf16>, vector<128x128xf32> -> vector<128x128xf32>
    %c0_43 = arith.constant 0 : index
    %c0_44 = arith.constant 0 : index
    %44 = vector.load %arg10[%c0_43, %c0_44] : memref<128x128xbf16, #tpu.memory_space<vmem>>, vector<128x128xbf16>
    %45 = arith.truncf %43 : vector<128x128xf32> to vector<128x128xbf16>
    %46 = tpu.concatenate %45, %44 in 1 : vector<128x128xbf16>, vector<128x128xbf16> -> vector<128x256xbf16>
    %c1_45 = arith.constant 1 : index
    %c0_46 = arith.constant 0 : index
    %c0_47 = arith.constant 0 : index
    %47 = vector.load %arg4[%c1_45, %c0_46, %c0_47] : memref<3x256x128xbf16, #tpu.memory_space<vmem>>, vector<1x256x128xbf16>
    %48 = vector.shape_cast %47 : vector<1x256x128xbf16> to vector<256x128xbf16>
    %cst_48 = arith.constant dense<0.000000e+00> : vector<128x128xf32>
    %49 = tpu.matmul %46, %48, %cst_48 {dimension_numbers = #tpu.dot_dimension_numbers<[1], [0], [0], [1], [0, 0, 1, 1], [], []>} : vector<128x256xbf16>, vector<256x128xbf16>, vector<128x128xf32> -> vector<128x128xf32>
    %c1_49 = arith.constant 1 : index
    %c0_50 = arith.constant 0 : index
    %50 = vector.load %arg5[%c1_49, %c0_50] : memref<3x128xf32, #tpu.memory_space<vmem>>, vector<1x128xf32>
    %51 = vector.broadcast %50 : vector<1x128xf32> to vector<128x128xf32>
    %52 = arith.addf %49, %51 : vector<128x128xf32>
    %cst_51 = arith.constant 0.000000e+00 : f32
    %53 = vector.broadcast %cst_51 : f32 to vector<128x128xf32>
    %54 = arith.cmpf ogt, %52, %53 : vector<128x128xf32>
    %cst_52 = arith.constant 0.0428594202 : f32
    %55 = vector.broadcast %cst_52 : f32 to vector<128x128xf32>
    %56 = arith.mulf %55, %52 : vector<128x128xf32>
    %57 = arith.select %54, %52, %56 : vector<128x128xi1>, vector<128x128xf32>
    %58 = arith.truncf %57 : vector<128x128xf32> to vector<128x128xbf16>
    %c0_53 = arith.constant 0 : index
    %c0_54 = arith.constant 0 : index
    %59 = vector.load %arg11[%c0_53, %c0_54] : memref<128x128xbf16, #tpu.memory_space<vmem>>, vector<128x128xbf16>
    tpu.vector_store %arg11[%c0_53, %c0_54], %58 {strides = array<i32>} : memref<128x128xbf16, #tpu.memory_space<vmem>>, vector<128x128xbf16>,
    %c0_55 = arith.constant 0 : index
    %c0_56 = arith.constant 0 : index
    %60 = vector.load %arg2[%c0_55, %c0_56] : memref<8x128xbf16, #tpu.memory_space<vmem>>, vector<8x128xbf16>
    %c0_57 = arith.constant 0 : index
    %c0_58 = arith.constant 0 : index
    %61 = vector.load %arg11[%c0_57, %c0_58] : memref<128x128xbf16, #tpu.memory_space<vmem>>, vector<128x128xbf16>
    %cst_59 = arith.constant dense<0.000000e+00> : vector<8x128xf32>
    %62 = tpu.matmul %60, %61, %cst_59 {dimension_numbers = #tpu.dot_dimension_numbers<[1], [0], [0], [1], [0, 0, 1, 1], [], []>} : vector<8x128xbf16>, vector<128x128xbf16>, vector<8x128xf32> -> vector<8x128xf32>
    %63 = arith.truncf %62 : vector<8x128xf32> to vector<8x128xbf16>
    %c0_60 = arith.constant 0 : index
    %c0_61 = arith.constant 0 : index
    %64 = vector.load %arg3[%c0_60, %c0_61] : memref<8x128xbf16, #tpu.memory_space<vmem>>, vector<8x128xbf16>
    %65 = tpu.concatenate %63, %64 in 1 : vector<8x128xbf16>, vector<8x128xbf16> -> vector<8x256xbf16>
    %c2 = arith.constant 2 : index
    %c0_62 = arith.constant 0 : index
    %c0_63 = arith.constant 0 : index
    %66 = vector.load %arg4[%c2, %c0_62, %c0_63] : memref<3x256x128xbf16, #tpu.memory_space<vmem>>, vector<1x256x128xbf16>
    %67 = vector.shape_cast %66 : vector<1x256x128xbf16> to vector<256x128xbf16>
    %cst_64 = arith.constant dense<0.000000e+00> : vector<8x128xf32>
    %68 = tpu.matmul %65, %67, %cst_64 {dimension_numbers = #tpu.dot_dimension_numbers<[1], [0], [0], [1], [0, 0, 1, 1], [], []>} : vector<8x256xbf16>, vector<256x128xbf16>, vector<8x128xf32> -> vector<8x128xf32>
    %c2_65 = arith.constant 2 : index
    %c0_66 = arith.constant 0 : index
    %69 = vector.load %arg5[%c2_65, %c0_66] : memref<3x128xf32, #tpu.memory_space<vmem>>, vector<1x128xf32>
    %70 = vector.broadcast %69 : vector<1x128xf32> to vector<8x128xf32>
    %71 = arith.addf %68, %70 : vector<8x128xf32>
    %cst_67 = arith.constant 0.000000e+00 : f32
    %72 = vector.broadcast %cst_67 : f32 to vector<8x128xf32>
    %73 = arith.cmpf ogt, %71, %72 : vector<8x128xf32>
    %cst_68 = arith.constant 0.0428594202 : f32
    %74 = vector.broadcast %cst_68 : f32 to vector<8x128xf32>
    %75 = arith.mulf %74, %71 : vector<8x128xf32>
    %76 = arith.select %73, %71, %75 : vector<8x128xi1>, vector<8x128xf32>
    %77 = arith.truncf %76 : vector<8x128xf32> to vector<8x128xbf16>
    %c0_69 = arith.constant 0 : index
    %c0_70 = arith.constant 0 : index
    %c0_71 = arith.constant 0 : index
    %78 = vector.load %arg6[%c0_69, %c0_70, %c0_71] : memref<2x128x128xbf16, #tpu.memory_space<vmem>>, vector<1x128x128xbf16>
    %79 = vector.shape_cast %78 : vector<1x128x128xbf16> to vector<128x128xbf16>
    %cst_72 = arith.constant dense<0.000000e+00> : vector<8x128xf32>
    %80 = tpu.matmul %77, %79, %cst_72 {dimension_numbers = #tpu.dot_dimension_numbers<[1], [0], [0], [1], [0, 0, 1, 1], [], []>} : vector<8x128xbf16>, vector<128x128xbf16>, vector<8x128xf32> -> vector<8x128xf32>
    %c0_73 = arith.constant 0 : index
    %c0_74 = arith.constant 0 : index
    %81 = vector.load %arg7[%c0_73, %c0_74] : memref<2x128xf32, #tpu.memory_space<vmem>>, vector<1x128xf32>
    %82 = vector.broadcast %81 : vector<1x128xf32> to vector<8x128xf32>
    %83 = arith.addf %80, %82 : vector<8x128xf32>
    %cst_75 = arith.constant 0.000000e+00 : f32
    %84 = vector.broadcast %cst_75 : f32 to vector<8x128xf32>
    %85 = arith.cmpf ogt, %83, %84 : vector<8x128xf32>
    %cst_76 = arith.constant 0.0428594202 : f32
    %86 = vector.broadcast %cst_76 : f32 to vector<8x128xf32>
    %87 = arith.mulf %86, %83 : vector<8x128xf32>
    %88 = arith.select %85, %83, %87 : vector<8x128xi1>, vector<8x128xf32>
    %89 = arith.truncf %88 : vector<8x128xf32> to vector<8x128xbf16>
    %c1_77 = arith.constant 1 : index
    %c0_78 = arith.constant 0 : index
    %c0_79 = arith.constant 0 : index
    %90 = vector.load %arg6[%c1_77, %c0_78, %c0_79] : memref<2x128x128xbf16, #tpu.memory_space<vmem>>, vector<1x128x128xbf16>
    %91 = vector.shape_cast %90 : vector<1x128x128xbf16> to vector<128x128xbf16>
    %cst_80 = arith.constant dense<0.000000e+00> : vector<8x128xf32>
    %92 = tpu.matmul %89, %91, %cst_80 {dimension_numbers = #tpu.dot_dimension_numbers<[1], [0], [0], [1], [0, 0, 1, 1], [], []>} : vector<8x128xbf16>, vector<128x128xbf16>, vector<8x128xf32> -> vector<8x128xf32>
    %c1_81 = arith.constant 1 : index
    %c0_82 = arith.constant 0 : index
    %93 = vector.load %arg7[%c1_81, %c0_82] : memref<2x128xf32, #tpu.memory_space<vmem>>, vector<1x128xf32>
    %94 = vector.broadcast %93 : vector<1x128xf32> to vector<8x128xf32>
    %95 = arith.addf %92, %94 : vector<8x128xf32>
    %c0_83 = arith.constant 0 : index
    %c0_84 = arith.constant 0 : index
    %96 = vector.load %arg8[%c0_83, %c0_84] : memref<8x128xf32, #tpu.memory_space<vmem>>, vector<8x128xf32>
    tpu.vector_store %arg8[%c0_83, %c0_84], %95 {strides = array<i32>} : memref<8x128xf32, #tpu.memory_space<vmem>>, vector<8x128xf32>,
    return
  }
}

</mosaic_0001>

<bundles_post_ra>
// kernel: graphsage_forward.1
= control target key start
LH: loop header
LB: loop body
LE: loop exit
PB: predicated region body
PF: predicated region fallthrough
CT: control target
= control target key end

     0   :  { %s2607_s0 = inlined_call_operand.vmem [shape: bf16[128,128], index: 0, kind: input, shape index: {}]   ;;  %s2608_s1 = inlined_call_operand.vmem [shape: bf16[128,128], index: 1, kind: input, shape index: {}]   ;;  %s2609_s2 = inlined_call_operand.vmem [shape: bf16[8,128], index: 2, kind: input, shape index: {}]   ;;  %s2610_s3 = inlined_call_operand.vmem [shape: bf16[8,128], index: 3, kind: input, shape index: {}]   ;;  %s2611_s4 = inlined_call_operand.vmem [shape: bf16[3,256,128], index: 4, kind: input, shape index: {}]   ;;  %s2612_s5 = inlined_call_operand.vmem [shape: f32[3,128], index: 5, kind: input, shape index: {}]   ;;  %s2613_s6 = inlined_call_operand.vmem [shape: bf16[2,128,128], index: 6, kind: input, shape index: {}]   ;;  %s2614_s7 = inlined_call_operand.vmem [shape: f32[2,128], index: 7, kind: input, shape index: {}]   ;;  %s2615_s8 = inlined_call_operand.vmem [shape: f32[8,128], index: 8, kind: output, shape index: {}]  }
   0x1   :  { %v60_v0 = vld [vmem:[%s2607_s0] sm:$0xff]  ;;  %v2144_v1 = vld [vmem:[%s2607_s0 + $0x8] sm:$0xff]  ;;  %v2149_v2 = vld [vmem:[%s2607_s0 + $0x10] sm:$0xff] }
   0x2   :  { %v2154_v3 = vld [vmem:[%s2607_s0 + $0x18] sm:$0xff]  ;;  %v2159_v4 = vld [vmem:[%s2607_s0 + $0x20] sm:$0xff]  ;;  %v2164_v5 = vld [vmem:[%s2607_s0 + $0x28] sm:$0xff] }
   0x3   :  { %v2169_v6 = vld [vmem:[%s2607_s0 + $0x30] sm:$0xff]  ;;  %v2174_v7 = vld [vmem:[%s2607_s0 + $0x38] sm:$0xff] }
   0x4   :  { %83 = vsyncadd [#allocation5], 1024 }
   0x5   :  { %2087 = dma.done.wait [#allocation5], 1024 }
   0x6   :  { %2088 = vsyncadd [#allocation5], 4294966272  ;;  %v2179_v8 = vld [vmem:[%s2607_s0] sm:$0xff]  ;;  %v2184_v9 = vld [vmem:[%s2607_s0 + $0x8] sm:$0xff] }
   0x7   :  { %v2189_v10 = vld [vmem:[%s2607_s0 + $0x10] sm:$0xff]  ;;  %v2194_v11 = vld [vmem:[%s2607_s0 + $0x18] sm:$0xff]  ;;  %v2199_v12 = vld [vmem:[%s2607_s0 + $0x20] sm:$0xff] }
   0x8   :  { %v2204_v13 = vld [vmem:[%s2607_s0 + $0x28] sm:$0xff]  ;;  %v2209_v14 = vld [vmem:[%s2607_s0 + $0x30] sm:$0xff]  ;;  %v2214_v15 = vld [vmem:[%s2607_s0 + $0x38] sm:$0xff] }
   0x9   :  { %145 = vsyncadd [#allocation5 + $0x1], 1024  ;;  %1905 = vmatprep.mubr.bf16.mxu0 %v60_v0  ;;  %v2015_v16 = vld [vmem:[%s2608_s1] sm:$0xff]   ;;  %v2222_v17 = vld [vmem:[%s2608_s1 + $0x8] sm:$0xff]  }
   0xa   :  { %1889 = vmatprep.subr.bf16.mxu0 %v2015_v16  ;;  %488 = vmatprep.mubr.bf16.mxu1 %v2015_v16  ;;  %v2228_v18 = vld [vmem:[%s2608_s1 + $0x10] sm:$0xff]   ;;  %v2234_v19 = vld [vmem:[%s2608_s1 + $0x18] sm:$0xff]   ;;  %v2023_v20 = vld [vmem:[%s2611_s4 + $0x40] sm:$0xff]  }
   0xb   :  { %1890 = vmatpush3.bf16.msra.mxu0 %v2015_v16  ;;  %v2024_v21 = vld [vmem:[%s2611_s4] sm:$0xff]   ;;  %1696 = vmatprep.subr.bf16.mxu1 %v2023_v20  ;;  %v2025_v23 = vld [vmem:[%s2611_s4 + $0x48] sm:$0xff]   ;;  %v2027_v25 = vld [vmem:[%s2611_s4 + $0x50] sm:$0xff]  }
   0xc   :  { %1891 = vmatprep.subr.bf16.mxu0 %v2222_v17  ;;  %v2246_v22 = vld [vmem:[%s2608_s1 + $0x20] sm:$0xff]   ;;  %1697 = vmatpush3.bf16.msra.mxu1 %v2024_v21  ;;  %v2026_v24 = vld [vmem:[%s2611_s4 + $0x8] sm:$0xff]   ;;  %v2028_v27 = vld [vmem:[%s2611_s4 + $0x10] sm:$0xff]  }
   0xd   :  { %1698 = vmatprep.subr.bf16.mxu1 %v2025_v23  ;;  %v2262_v26 = vld [vmem:[%s2608_s1 + $0x28] sm:$0xff]   ;;  %v2029_v28 = vld [vmem:[%s2611_s4 + $0x58] sm:$0xff]   ;;  %v2275_v29 = vld [vmem:[%s2608_s1 + $0x30] sm:$0xff]  }
   0xe   :  { %v2030_v30 = vld [vmem:[%s2611_s4 + $0x18] sm:$0xff]   ;;  %v2031_v31 = vld [vmem:[%s2611_s4 + $0x60] sm:$0xff]   ;;  %v2033_v34 = vld [vmem:[%s2611_s4 + $0x68] sm:$0xff]  }
   0xf   :  { %1892 = vmatpush3.bf16.msra.mxu0 %v2222_v17  ;;  %v2032_v32 = vld [vmem:[%s2611_s4 + $0x20] sm:$0xff]   ;;  %v2022_v33 = vld [vmem:[%s2608_s1 + $0x38] sm:$0xff]   ;;  %v2034_v35 = vld [vmem:[%s2611_s4 + $0x28] sm:$0xff]  }
  0x10   :  { %1893 = vmatprep.subr.bf16.mxu0 %v2228_v18  ;;  %1699 = vmatpush3.bf16.msra.mxu1 %v2026_v24  ;;  %v2035_v36 = vld [vmem:[%s2611_s4 + $0x70] sm:$0xff]   ;;  %v2037_v38 = vld [vmem:[%s2611_s4 + $0x78] sm:$0xff]  }
  0x11   :  { %1700 = vmatprep.subr.bf16.mxu1 %v2027_v25  ;;  %v2036_v37 = vld [vmem:[%s2611_s4 + $0x30] sm:$0xff]   ;;  %v2038_v39 = vld [vmem:[%s2611_s4 + $0x38] sm:$0xff]  }
  0x13   :  { %1894 = vmatpush3.bf16.msra.mxu0 %v2228_v18 }
  0x14   :  { %1895 = vmatprep.subr.bf16.mxu0 %v2234_v19  ;;  %1701 = vmatpush3.bf16.msra.mxu1 %v2028_v27 }
  0x15   :  { %1702 = vmatprep.subr.bf16.mxu1 %v2029_v28 }
  0x17   :  { %1896 = vmatpush3.bf16.msra.mxu0 %v2234_v19 }
  0x18   :  { %1897 = vmatprep.subr.bf16.mxu0 %v2246_v22  ;;  %1703 = vmatpush3.bf16.msra.mxu1 %v2030_v30 }
  0x19   :  { %1704 = vmatprep.subr.bf16.mxu1 %v2031_v31 }
  0x1b   :  { %1898 = vmatpush3.bf16.msra.mxu0 %v2246_v22 }
  0x1c   :  { %1899 = vmatprep.subr.bf16.mxu0 %v2262_v26  ;;  %1705 = vmatpush3.bf16.msra.mxu1 %v2032_v32 }
  0x1d   :  { %1706 = vmatprep.subr.bf16.mxu1 %v2033_v34 }
  0x1f   :  { %1900 = vmatpush3.bf16.msra.mxu0 %v2262_v26 }
  0x20   :  { %1901 = vmatprep.subr.bf16.mxu0 %v2275_v29  ;;  %1707 = vmatpush3.bf16.msra.mxu1 %v2034_v35 }
  0x21   :  { %1708 = vmatprep.subr.bf16.mxu1 %v2035_v36 }
  0x23   :  { %1902 = vmatpush3.bf16.msra.mxu0 %v2275_v29 }
  0x24   :  { %1903 = vmatprep.subr.bf16.mxu0 %v2022_v33  ;;  %1709 = vmatpush3.bf16.msra.mxu1 %v2036_v37 }
  0x25   :  { %1710 = vmatprep.subr.bf16.mxu1 %v2037_v38 }
  0x27   :  { %1904 = vmatpush3.bf16.msra.mxu0 %v2022_v33 }
  0x28   :  { %1711 = vmatpush3.bf16.msra.mxu1 %v2038_v39 }
  0x2a   :  { %1906 = vmatmul.mubr.bf16.vlgmr.msra.gmra.mrb[0].mxu0 %v2144_v1  ;;  %v2328_v1 = vld [vmem:[%s2612_s5] ss:$0 sm:$0xff] }
  0x2b   :  { %1909 = vmatprep.mubr.bf16.mxu0 %v2149_v2 }
  0x32   :  { %1910 = vmatmul.mubr.bf16.gmra.mrb[4].mxu0 %v2154_v3 }
  0x33   :  { %1913 = vmatprep.mubr.bf16.mxu0 %v2159_v4 }
  0x3a   :  { %1914 = vmatmul.mubr.bf16.gmra.mrb[8].mxu0 %v2164_v5 }
  0x3b   :  { %1917 = vmatprep.mubr.bf16.mxu0 %v2169_v6 }
  0x42   :  { %1918 = vmatmul.mubr.bf16.gmra.mrb[12].mxu0 %v2174_v7 }
  0x43   :  { %1937 = vmatprep.mubr.bf16.mxu0 %v2179_v8 }
  0xfd   :  { %v1907_v40 = vpop.f32.mrb[0].mxu0 }
  0xfe   :  { %v252_v41 = vpop.f32.mrb[1].mxu0 }
  0xff   :  { %v1908_v42 = vpop.f32.mrb[2].mxu0 }
 0x100   :  { %v316_v43 = vpack.c.bf16 %v1908_v42, %v1907_v40  ;;  %v255_v44 = vpop.f32.mrb[3].mxu0 }
 0x101   :  { %v315_v45 = vpack.c.bf16 %v255_v44, %v252_v41 }
 0x103   :  { %489 = vmatmul.mubr.bf16.vlgmr.msra.gmra.mrb[0].mxu1 %v315_v45 }
 0x104   :  { %496 = vmatprep.mubr.bf16.mxu1 %v2222_v17 }
 0x105   :  { %v1911_v46 = vpop.f32.mrb[4].mxu0 }
 0x106   :  { %v268_v47 = vpop.f32.mrb[5].mxu0 }
 0x107   :  { %v1912_v48 = vpop.f32.mrb[6].mxu0 }
 0x108   :  { %v318_v49 = vpack.c.bf16 %v1912_v48, %v1911_v46  ;;  %v271_v50 = vpop.f32.mrb[7].mxu0 }
 0x109   :  { %v317_v51 = vpack.c.bf16 %v271_v50, %v268_v47 }
 0x10b   :  { %497 = vmatmul.mubr.bf16.gmra.mrb[4].mxu1 %v316_v43 }
 0x10c   :  { %504 = vmatprep.mubr.bf16.mxu1 %v2228_v18 }
 0x10d   :  { %v1915_v52 = vpop.f32.mrb[8].mxu0 }
 0x10e   :  { %v284_v53 = vpop.f32.mrb[9].mxu0 }
 0x10f   :  { %v1916_v54 = vpop.f32.mrb[10].mxu0 }
 0x110   :  { %v320_v55 = vpack.c.bf16 %v1916_v54, %v1915_v52  ;;  %v287_v56 = vpop.f32.mrb[11].mxu0 }
 0x111   :  { %v319_v57 = vpack.c.bf16 %v287_v56, %v284_v53 }
 0x113   :  { %505 = vmatmul.mubr.bf16.gmra.mrb[8].mxu1 %v317_v51 }
 0x114   :  { %512 = vmatprep.mubr.bf16.mxu1 %v2234_v19 }
 0x115   :  { %v1919_v58 = vpop.f32.mrb[12].mxu0 }
 0x116   :  { %v300_v59 = vpop.f32.mrb[13].mxu0 }
 0x117   :  { %v1920_v60 = vpop.f32.mrb[14].mxu0 }
 0x118   :  { %v322_v61 = vpack.c.bf16 %v1920_v60, %v1919_v58  ;;  %v303_v62 = vpop.f32.mrb[15].mxu0 }
 0x119   :  { %v321_v63 = vpack.c.bf16 %v303_v62, %v300_v59 }
 0x11b   :  { %513 = vmatmul.mubr.bf16.gmra.mrb[12].mxu1 %v318_v49 }
 0x11c   :  { %520 = vmatprep.mubr.bf16.mxu1 %v2246_v22 }
 0x123   :  { %521 = vmatmul.mubr.bf16.gmra.mrb[16].mxu1 %v319_v57 }
 0x124   :  { %528 = vmatprep.mubr.bf16.mxu1 %v2262_v26 }
 0x12b   :  { %529 = vmatmul.mubr.bf16.gmra.mrb[20].mxu1 %v320_v55 }
 0x12c   :  { %536 = vmatprep.mubr.bf16.mxu1 %v2275_v29 }
 0x133   :  { %537 = vmatmul.mubr.bf16.gmra.mrb[24].mxu1 %v321_v63 }
 0x134   :  { %544 = vmatprep.mubr.bf16.mxu1 %v2022_v33 }
 0x13b   :  { %545 = vmatmul.mubr.bf16.gmra.mrb[28].mxu1 %v322_v61 }
 0x1d6   :  { %v1712_v0 = vpop.f32.mrb[0].mxu1 }
 0x1d7   :  { %v1713_v2 = vpop.f32.mrb[1].mxu1 }
 0x1d8   :  { %v1714_v3 = vadd.f32 %v1713_v2, %v1712_v0  ;;  %v1715_v4 = vpop.f32.mrb[2].mxu1 }
 0x1d9   :  { %v1716_v5 = vpop.f32.mrb[3].mxu1 }
 0x1da   :  { %v491_v6 = vadd.f32 %v1714_v3, %v2328_v1  ;;  %v1717_v7 = vadd.f32 %v1716_v5, %v1715_v4 }
 0x1dc   :  { %v569_v16 = vmul.f32 0.04285942, %v491_v6  ;;  %v494_v17 = vadd.f32 %v1717_v7, %v2328_v1  ;;  %vm553_vm0 = vcmp.gt.f32.partialorder %v491_v6, 0.0 }
 0x1de   :  { %vm554_vm1 = vcmp.gt.f32.partialorder %v494_v17, 0.0  ;;  %v570_v18 = vmul.f32 0.04285942, %v494_v17  ;;  %v1718_v19 = vpop.f32.mrb[4].mxu1  ;;  %v585_v21 = vsel %vm553_vm0, %v491_v6, %v569_v16 }
 0x1df   :  { %v1719_v20 = vpop.f32.mrb[5].mxu1 }
 0x1e0   :  { %v586_v22 = vsel %vm554_vm1, %v494_v17, %v570_v18  ;;  %v1720_v23 = vadd.f32 %v1719_v20, %v1718_v19  ;;  %v1721_v24 = vpop.f32.mrb[6].mxu1 }
 0x1e1   :  { %v2332_v25 = vpack.c.bf16 %v586_v22, %v585_v21  ;;  %v1722_v26 = vpop.f32.mrb[7].mxu1 }
 0x1e2   :  { %v499_v27 = vadd.f32 %v1720_v23, %v2328_v1  ;;  %v1723_v28 = vadd.f32 %v1722_v26, %v1721_v24 }
 0x1e3   :  { %1921 = vmatprep.subr.bf16.mxu0 %v2332_v25 }
 0x1e4   :  { %v571_v29 = vmul.f32 0.04285942, %v499_v27  ;;  %v502_v30 = vadd.f32 %v1723_v28, %v2328_v1  ;;  %vm555_vm2 = vcmp.gt.f32.partialorder %v499_v27, 0.0 }
 0x1e6   :  { %vm556_vm3 = vcmp.gt.f32.partialorder %v502_v30, 0.0  ;;  %v572_v31 = vmul.f32 0.04285942, %v502_v30  ;;  %v1724_v32 = vpop.f32.mrb[8].mxu1  ;;  %v587_v34 = vsel %vm555_vm2, %v499_v27, %v571_v29 }
 0x1e7   :  { %v1725_v33 = vpop.f32.mrb[9].mxu1 }
 0x1e8   :  { %v588_v35 = vsel %vm556_vm3, %v502_v30, %v572_v31  ;;  %v1726_v36 = vadd.f32 %v1725_v33, %v1724_v32  ;;  %v1727_v37 = vpop.f32.mrb[10].mxu1 }
 0x1e9   :  { %v2336_v38 = vpack.c.bf16 %v588_v35, %v587_v34  ;;  %v1728_v39 = vpop.f32.mrb[11].mxu1 }
 0x1ea   :  { %v507_v40 = vadd.f32 %v1726_v36, %v2328_v1  ;;  %v1729_v41 = vadd.f32 %v1728_v39, %v1727_v37 }
 0x1ec   :  { %v573_v42 = vmul.f32 0.04285942, %v507_v40  ;;  %v510_v43 = vadd.f32 %v1729_v41, %v2328_v1  ;;  %vm557_vm4 = vcmp.gt.f32.partialorder %v507_v40, 0.0 }
 0x1ee   :  { %vm558_vm5 = vcmp.gt.f32.partialorder %v510_v43, 0.0  ;;  %v574_v44 = vmul.f32 0.04285942, %v510_v43  ;;  %v1730_v45 = vpop.f32.mrb[12].mxu1  ;;  %v589_v47 = vsel %vm557_vm4, %v507_v40, %v573_v42 }
 0x1ef   :  { %v1731_v46 = vpop.f32.mrb[13].mxu1 }
 0x1f0   :  { %v590_v48 = vsel %vm558_vm5, %v510_v43, %v574_v44  ;;  %v1732_v49 = vadd.f32 %v1731_v46, %v1730_v45  ;;  %v1733_v50 = vpop.f32.mrb[14].mxu1 }
 0x1f1   :  { %v2340_v51 = vpack.c.bf16 %v590_v48, %v589_v47  ;;  %v1734_v52 = vpop.f32.mrb[15].mxu1 }
 0x1f2   :  { %v515_v53 = vadd.f32 %v1732_v49, %v2328_v1  ;;  %v1735_v54 = vadd.f32 %v1734_v52, %v1733_v50 }
 0x1f4   :  { %v575_v55 = vmul.f32 0.04285942, %v515_v53  ;;  %v518_v56 = vadd.f32 %v1735_v54, %v2328_v1  ;;  %vm559_vm6 = vcmp.gt.f32.partialorder %v515_v53, 0.0 }
 0x1f6   :  { %vm560_vm7 = vcmp.gt.f32.partialorder %v518_v56, 0.0  ;;  %v576_v57 = vmul.f32 0.04285942, %v518_v56  ;;  %v1736_v58 = vpop.f32.mrb[16].mxu1  ;;  %v591_v60 = vsel %vm559_vm6, %v515_v53, %v575_v55 }
 0x1f7   :  { %v1737_v59 = vpop.f32.mrb[17].mxu1 }
 0x1f8   :  { %v592_v61 = vsel %vm560_vm7, %v518_v56, %v576_v57  ;;  %v1738_v62 = vadd.f32 %v1737_v59, %v1736_v58  ;;  %v1739_v63 = vpop.f32.mrb[18].mxu1 }
 0x1f9   :  { %v2344_v0 = vpack.c.bf16 %v592_v61, %v591_v60  ;;  %v1740_v2 = vpop.f32.mrb[19].mxu1 }
 0x1fa   :  { %v523_v3 = vadd.f32 %v1738_v62, %v2328_v1  ;;  %v1741_v4 = vadd.f32 %v1740_v2, %v1739_v63 }
 0x1fc   :  { %v577_v5 = vmul.f32 0.04285942, %v523_v3  ;;  %v526_v6 = vadd.f32 %v1741_v4, %v2328_v1  ;;  %vm561_vm8 = vcmp.gt.f32.partialorder %v523_v3, 0.0 }
 0x1fe   :  { %vm562_vm9 = vcmp.gt.f32.partialorder %v526_v6, 0.0  ;;  %v578_v7 = vmul.f32 0.04285942, %v526_v6  ;;  %v1742_v16 = vpop.f32.mrb[20].mxu1  ;;  %v593_v18 = vsel %vm561_vm8, %v523_v3, %v577_v5 }
 0x1ff   :  { %v1743_v17 = vpop.f32.mrb[21].mxu1 }
 0x200   :  { %v594_v19 = vsel %vm562_vm9, %v526_v6, %v578_v7  ;;  %v1744_v20 = vadd.f32 %v1743_v17, %v1742_v16  ;;  %v1745_v21 = vpop.f32.mrb[22].mxu1 }
 0x201   :  { %v2348_v22 = vpack.c.bf16 %v594_v19, %v593_v18  ;;  %v1746_v23 = vpop.f32.mrb[23].mxu1 }
 0x202   :  { %v531_v24 = vadd.f32 %v1744_v20, %v2328_v1  ;;  %v1747_v26 = vadd.f32 %v1746_v23, %v1745_v21 }
 0x204   :  { %v579_v27 = vmul.f32 0.04285942, %v531_v24  ;;  %v534_v28 = vadd.f32 %v1747_v26, %v2328_v1  ;;  %vm563_vm10 = vcmp.gt.f32.partialorder %v531_v24, 0.0 }
 0x206   :  { %vm564_vm11 = vcmp.gt.f32.partialorder %v534_v28, 0.0  ;;  %v580_v29 = vmul.f32 0.04285942, %v534_v28  ;;  %v1748_v30 = vpop.f32.mrb[24].mxu1  ;;  %v595_v32 = vsel %vm563_vm10, %v531_v24, %v579_v27 }
 0x207   :  { %v1749_v31 = vpop.f32.mrb[25].mxu1 }
 0x208   :  { %v596_v33 = vsel %vm564_vm11, %v534_v28, %v580_v29  ;;  %v1750_v34 = vadd.f32 %v1749_v31, %v1748_v30  ;;  %v1751_v35 = vpop.f32.mrb[26].mxu1 }
 0x209   :  { %v2352_v36 = vpack.c.bf16 %v596_v33, %v595_v32  ;;  %v1752_v37 = vpop.f32.mrb[27].mxu1 }
 0x20a   :  { %v539_v39 = vadd.f32 %v1750_v34, %v2328_v1  ;;  %v1753_v40 = vadd.f32 %v1752_v37, %v1751_v35 }
 0x20c   :  { %v581_v41 = vmul.f32 0.04285942, %v539_v39  ;;  %v542_v42 = vadd.f32 %v1753_v40, %v2328_v1  ;;  %vm565_vm12 = vcmp.gt.f32.partialorder %v539_v39, 0.0 }
 0x20e   :  { %vm566_vm13 = vcmp.gt.f32.partialorder %v542_v42, 0.0  ;;  %v582_v43 = vmul.f32 0.04285942, %v542_v42  ;;  %v1754_v44 = vpop.f32.mrb[28].mxu1  ;;  %v597_v46 = vsel %vm565_vm12, %v539_v39, %v581_v41 }
 0x20f   :  { %v1755_v45 = vpop.f32.mrb[29].mxu1 }
 0x210   :  { %v598_v47 = vsel %vm566_vm13, %v542_v42, %v582_v43  ;;  %v1756_v48 = vadd.f32 %v1755_v45, %v1754_v44  ;;  %v1757_v49 = vpop.f32.mrb[30].mxu1 }
 0x211   :  { %v2356_v50 = vpack.c.bf16 %v598_v47, %v597_v46  ;;  %v1758_v52 = vpop.f32.mrb[31].mxu1 }
 0x212   :  { %v547_v53 = vadd.f32 %v1756_v48, %v2328_v1  ;;  %v1759_v54 = vadd.f32 %v1758_v52, %v1757_v49 }
 0x214   :  { %v583_v55 = vmul.f32 0.04285942, %v547_v53  ;;  %v550_v56 = vadd.f32 %v1759_v54, %v2328_v1  ;;  %vm567_vm14 = vcmp.gt.f32.partialorder %v547_v53, 0.0 }
 0x216   :  { %vm568_vm15 = vcmp.gt.f32.partialorder %v550_v56, 0.0  ;;  %v584_v57 = vmul.f32 0.04285942, %v550_v56  ;;  %v599_v58 = vsel %vm567_vm14, %v547_v53, %v583_v55 }
 0x218   :  { %v600_v59 = vsel %vm568_vm15, %v550_v56, %v584_v57 }
 0x219   :  { %v2360_v60 = vpack.c.bf16 %v600_v59, %v599_v58 }
 0x21a   :  { %2089 = dma.done.wait [#allocation5 + $0x1], 1024 }
 0x21b   :  { %2090 = vsyncadd [#allocation5 + $0x1], 4294966272  ;;  %1922 = vmatpush3.bf16.msra.mxu0 %v2332_v25  ;;  %v2039_v8 = vld [vmem:[%s2611_s4 + $0xc0] sm:$0xff]   ;;  %v2041_v61 = vld [vmem:[%s2611_s4 + $0xc8] sm:$0xff]   ;;  %vm2092_vm0 = vmmov 0  }
 0x21c   :  { %1923 = vmatprep.subr.bf16.mxu0 %v2336_v38  ;;  %v2040_v1 = vld [vmem:[%s2611_s4 + $0x80] sm:$0xff]   ;;  %v2042_v62 = vld [vmem:[%s2611_s4 + $0x88] sm:$0xff]   ;;  %v2043_v63 = vld [vmem:[%s2611_s4 + $0xd0] sm:$0xff]  }
 0x21d   :  { %v2044_v2 = vld [vmem:[%s2611_s4 + $0x90] sm:$0xff]   ;;  %v2045_v3 = vld [vmem:[%s2611_s4 + $0xd8] sm:$0xff]   ;;  %v2048_v4 = vld [vmem:[%s2611_s4 + $0xa0] sm:$0xff]  }
 0x21e   :  { %v2049_v5 = vld [vmem:[%s2611_s4 + $0xe8] sm:$0xff]   ;;  %v2052_v6 = vld [vmem:[%s2611_s4 + $0xb0] sm:$0xff]  }
 0x21f   :  { %1924 = vmatpush3.bf16.msra.mxu0 %v2336_v38 }
 0x220   :  { %1925 = vmatprep.subr.bf16.mxu0 %v2340_v51 }
 0x223   :  { %1926 = vmatpush3.bf16.msra.mxu0 %v2340_v51 }
 0x224   :  { %1927 = vmatprep.subr.bf16.mxu0 %v2344_v0 }
 0x227   :  { %1928 = vmatpush3.bf16.msra.mxu0 %v2344_v0 }
 0x228   :  { %1929 = vmatprep.subr.bf16.mxu0 %v2348_v22 }
 0x22b   :  { %1930 = vmatpush3.bf16.msra.mxu0 %v2348_v22 }
 0x22c   :  { %1931 = vmatprep.subr.bf16.mxu0 %v2352_v36 }
 0x22f   :  { %1932 = vmatpush3.bf16.msra.mxu0 %v2352_v36 }
 0x230   :  { %1933 = vmatprep.subr.bf16.mxu0 %v2356_v50 }
 0x233   :  { %1934 = vmatpush3.bf16.msra.mxu0 %v2356_v50 }
 0x234   :  { %1935 = vmatprep.subr.bf16.mxu0 %v2360_v60 }
 0x237   :  { %1936 = vmatpush3.bf16.msra.mxu0 %v2360_v60 }
 0x238   :  { %1776 = vmatprep.subr.bf16.mxu0 %v2039_v8 }
 0x23a   :  { %1938 = vmatmul.mubr.bf16.vlgmr.msra.gmra.mrb[16].mxu0 %v2184_v9  ;;  %v2046_v9 = vld [vmem:[%s2611_s4 + $0x98] sm:$0xff]  }
 0x23b   :  { %1941 = vmatprep.mubr.bf16.mxu0 %v2189_v10  ;;  %1777 = vmatpush3.bf16.msra.mxu0 %v2040_v1  ;;  %v2047_v10 = vld [vmem:[%s2611_s4 + $0xe0] sm:$0xff]  }
 0x23c   :  { %1778 = vmatprep.subr.bf16.mxu0 %v2041_v61 }
 0x23f   :  { %1779 = vmatpush3.bf16.msra.mxu0 %v2042_v62 }
 0x240   :  { %1780 = vmatprep.subr.bf16.mxu0 %v2043_v63 }
 0x242   :  { %1942 = vmatmul.mubr.bf16.gmra.mrb[20].mxu0 %v2194_v11  ;;  %v2050_v11 = vld [vmem:[%s2611_s4 + $0xa8] sm:$0xff]  }
 0x243   :  { %1945 = vmatprep.mubr.bf16.mxu0 %v2199_v12  ;;  %1781 = vmatpush3.bf16.msra.mxu0 %v2044_v2  ;;  %v2051_v12 = vld [vmem:[%s2611_s4 + $0xf0] sm:$0xff]  }
 0x244   :  { %1782 = vmatprep.subr.bf16.mxu0 %v2045_v3 }
 0x247   :  { %1783 = vmatpush3.bf16.msra.mxu0 %v2046_v9 }
 0x248   :  { %1784 = vmatprep.subr.bf16.mxu0 %v2047_v10 }
 0x24a   :  { %1946 = vmatmul.mubr.bf16.gmra.mrb[24].mxu0 %v2204_v13  ;;  %v2053_v13 = vld [vmem:[%s2611_s4 + $0xf8] sm:$0xff]  }
 0x24b   :  { %1949 = vmatprep.mubr.bf16.mxu0 %v2209_v14  ;;  %1785 = vmatpush3.bf16.msra.mxu0 %v2048_v4  ;;  %v2054_v14 = vld [vmem:[%s2611_s4 + $0xb8] sm:$0xff]  }
 0x24c   :  { %1786 = vmatprep.subr.bf16.mxu0 %v2049_v5 }
 0x24f   :  { %1787 = vmatpush3.bf16.msra.mxu0 %v2050_v11 }
 0x250   :  { %1788 = vmatprep.subr.bf16.mxu0 %v2051_v12 }
 0x252   :  { %1950 = vmatmul.mubr.bf16.gmra.mrb[28].mxu0 %v2214_v15 }
 0x253   :  { %1789 = vmatpush3.bf16.msra.mxu0 %v2052_v6  ;;  %906 = vmatprep.mubr.bf16.mxu0 %v2332_v25 }
 0x254   :  { %1790 = vmatprep.subr.bf16.mxu0 %v2053_v13 }
 0x257   :  { %1791 = vmatpush3.bf16.msra.mxu0 %v2054_v14 }
 0x30d   :  { %v1939_v7 = vpop.f32.mrb[16].mxu0 }
 0x30e   :  { %v669_v16 = vpop.f32.mrb[17].mxu0 }
 0x30f   :  { %v1940_v17 = vpop.f32.mrb[18].mxu0 }
 0x310   :  { %v733_v18 = vpack.c.bf16 %v1940_v17, %v1939_v7  ;;  %v672_v19 = vpop.f32.mrb[19].mxu0 }
 0x311   :  { %v732_v20 = vpack.c.bf16 %v672_v19, %v669_v16 }
 0x313   :  { %907 = vmatmul.mubr.bf16.vlgmr.msra.gmra.mrb[32].mxu0 %v732_v20 }
 0x314   :  { %914 = vmatprep.mubr.bf16.mxu0 %v2336_v38 }
 0x315   :  { %v1943_v15 = vpop.f32.mrb[20].mxu0 }
 0x316   :  { %v685_v25 = vpop.f32.mrb[21].mxu0 }
 0x317   :  { %v1944_v21 = vpop.f32.mrb[22].mxu0 }
 0x318   :  { %v735_v23 = vpack.c.bf16 %v1944_v21, %v1943_v15  ;;  %v688_v24 = vpop.f32.mrb[23].mxu0 }
 0x319   :  { %v734_v26 = vpack.c.bf16 %v688_v24, %v685_v25 }
 0x31b   :  { %915 = vmatmul.mubr.bf16.gmra.mrb[36].mxu0 %v733_v18 }
 0x31c   :  { %922 = vmatprep.mubr.bf16.mxu0 %v2340_v51  ;;  %v2091_v51 = vmov 0.0  }
 0x31d   :  { %v1947_v27 = vpop.f32.mrb[24].mxu0  ;;  %1953 = vmatprep.subr.bf16.mxu1 %v2091_v51  ;;  %1973 = vmatprep.subr.bf16.mxu0 %v2091_v51 }
 0x31e   :  { %v701_v28 = vpop.f32.mrb[25].mxu0  ;;  %1969 = vmatprep.mubr.msk.bf16.mxu1 %vm2092_vm0, %v2091_v51 }
 0x31f   :  { %v1948_v29 = vpop.f32.mrb[26].mxu0 }
 0x320   :  { %v737_v30 = vpack.c.bf16 %v1948_v29, %v1947_v27  ;;  %v704_v31 = vpop.f32.mrb[27].mxu0 }
 0x321   :  { %v736_v32 = vpack.c.bf16 %v704_v31, %v701_v28 }
 0x323   :  { %923 = vmatmul.mubr.bf16.gmra.mrb[40].mxu0 %v734_v26 }
 0x324   :  { %930 = vmatprep.mubr.bf16.mxu0 %v2344_v0 }
 0x325   :  { %v1951_v33 = vpop.f32.mrb[28].mxu0 }
 0x326   :  { %v717_v38 = vpop.f32.mrb[29].mxu0 }
 0x327   :  { %v1952_v34 = vpop.f32.mrb[30].mxu0 }
 0x328   :  { %v739_v35 = vpack.c.bf16 %v1952_v34, %v1951_v33  ;;  %v720_v37 = vpop.f32.mrb[31].mxu0 }
 0x329   :  { %v738_v39 = vpack.c.bf16 %v720_v37, %v717_v38 }
 0x32b   :  { %931 = vmatmul.mubr.bf16.gmra.mrb[44].mxu0 %v735_v23 }
 0x32c   :  { %938 = vmatprep.mubr.bf16.mxu0 %v2348_v22  ;;  %v2451_v22 = vld [vmem:[%s2612_s5 + $0x1] ss:$0 sm:$0xff] }
 0x333   :  { %939 = vmatmul.mubr.bf16.gmra.mrb[48].mxu0 %v736_v32 }
 0x334   :  { %946 = vmatprep.mubr.bf16.mxu0 %v2352_v36 }
 0x33b   :  { %947 = vmatmul.mubr.bf16.gmra.mrb[52].mxu0 %v737_v30 }
 0x33c   :  { %954 = vmatprep.mubr.bf16.mxu0 %v2356_v50 }
 0x343   :  { %955 = vmatmul.mubr.bf16.gmra.mrb[56].mxu0 %v738_v39 }
 0x344   :  { %962 = vmatprep.mubr.bf16.mxu0 %v2360_v60 }
 0x34b   :  { %963 = vmatmul.mubr.bf16.gmra.mrb[60].mxu0 %v739_v35 }
 0x34c   :  { %1989 = vmatprep.mubr.msk.bf16.mxu0 %vm2092_vm0, %v2091_v51 }
 0x3e6   :  { %v1792_v0 = vpop.f32.mrb[32].mxu0 }
 0x3e7   :  { %v1793_v36 = vpop.f32.mrb[33].mxu0 }
 0x3e8   :  { %v1794_v40 = vadd.f32 %v1793_v36, %v1792_v0  ;;  %v1795_v41 = vpop.f32.mrb[34].mxu0 }
 0x3e9   :  { %v1796_v42 = vpop.f32.mrb[35].mxu0 }
 0x3ea   :  { %v909_v43 = vadd.f32 %v1794_v40, %v2451_v22  ;;  %v1797_v44 = vadd.f32 %v1796_v42, %v1795_v41 }
 0x3ec   :  { %v912_v45 = vadd.f32 %v1797_v44, %v2451_v22  ;;  %v987_v46 = vmul.f32 0.04285942, %v909_v43  ;;  %vm971_vm1 = vcmp.gt.f32.partialorder %v909_v43, 0.0 }
 0x3ee   :  { %v1798_v47 = vpop.f32.mrb[36].mxu0  ;;  %vm972_vm2 = vcmp.gt.f32.partialorder %v912_v45, 0.0  ;;  %v988_v48 = vmul.f32 0.04285942, %v912_v45  ;;  %v1003_v53 = vsel %vm971_vm1, %v909_v43, %v987_v46 }
 0x3ef   :  { %v1799_v49 = vpop.f32.mrb[37].mxu0 }
 0x3f0   :  { %v1800_v50 = vadd.f32 %v1799_v49, %v1798_v47  ;;  %v1801_v52 = vpop.f32.mrb[38].mxu0  ;;  %v1004_v54 = vsel %vm972_vm2, %v912_v45, %v988_v48 }
 0x3f1   :  { %v1802_v55 = vpop.f32.mrb[39].mxu0  ;;  %v1019_v56 = vpack.c.bf16 %v1004_v54, %v1003_v53 }
 0x3f2   :  { %v917_v57 = vadd.f32 %v1800_v50, %v2451_v22  ;;  %v1803_v58 = vadd.f32 %v1802_v55, %v1801_v52 }
 0x3f3   :  { %1954 = vmatpush3.bf16.msra.mxu1 %v1019_v56 }
 0x3f4   :  { %v989_v59 = vmul.f32 0.04285942, %v917_v57  ;;  %v920_v60 = vadd.f32 %v1803_v58, %v2451_v22  ;;  %1955 = vmatprep.subr.bf16.mxu1 %v2091_v51  ;;  %vm973_vm3 = vcmp.gt.f32.partialorder %v917_v57, 0.0 }
 0x3f6   :  { %vm974_vm4 = vcmp.gt.f32.partialorder %v920_v60, 0.0  ;;  %v990_v8 = vmul.f32 0.04285942, %v920_v60  ;;  %v1804_v1 = vpop.f32.mrb[40].mxu0  ;;  %v1005_v2 = vsel %vm973_vm3, %v917_v57, %v989_v59 }
 0x3f7   :  { %v1805_v61 = vpop.f32.mrb[41].mxu0 }
 0x3f8   :  { %v1806_v62 = vadd.f32 %v1805_v61, %v1804_v1  ;;  %v1807_v63 = vpop.f32.mrb[42].mxu0  ;;  %v1006_v3 = vsel %vm974_vm4, %v920_v60, %v990_v8 }
 0x3f9   :  { %v1808_v9 = vpop.f32.mrb[43].mxu0  ;;  %v1020_v10 = vpack.c.bf16 %v1006_v3, %v1005_v2 }
 0x3fa   :  { %v925_v4 = vadd.f32 %v1806_v62, %v2451_v22  ;;  %v1809_v5 = vadd.f32 %v1808_v9, %v1807_v63 }
 0x3fb   :  { %1956 = vmatpush3.bf16.msra.mxu1 %v1020_v10 }
 0x3fc   :  { %v991_v11 = vmul.f32 0.04285942, %v925_v4  ;;  %v928_v12 = vadd.f32 %v1809_v5, %v2451_v22  ;;  %1957 = vmatprep.subr.bf16.mxu1 %v2091_v51  ;;  %vm975_vm5 = vcmp.gt.f32.partialorder %v925_v4, 0.0 }
 0x3fe   :  { %vm976_vm6 = vcmp.gt.f32.partialorder %v928_v12, 0.0  ;;  %v992_v6 = vmul.f32 0.04285942, %v928_v12  ;;  %v1810_v13 = vpop.f32.mrb[44].mxu0  ;;  %v1007_v17 = vsel %vm975_vm5, %v925_v4, %v991_v11 }
 0x3ff   :  { %v1811_v14 = vpop.f32.mrb[45].mxu0 }
 0x400   :  { %v1812_v7 = vadd.f32 %v1811_v14, %v1810_v13  ;;  %v1813_v16 = vpop.f32.mrb[46].mxu0  ;;  %v1008_v18 = vsel %vm976_vm6, %v928_v12, %v992_v6 }
 0x401   :  { %v1814_v19 = vpop.f32.mrb[47].mxu0  ;;  %v1021_v20 = vpack.c.bf16 %v1008_v18, %v1007_v17  ;;  %v2055_v18 = vld [vmem:[%s2611_s4 + $0x140] sm:$0xff]  }
 0x402   :  { %v933_v15 = vadd.f32 %v1812_v7, %v2451_v22  ;;  %v1815_v25 = vadd.f32 %v1814_v19, %v1813_v16 }
 0x403   :  { %1958 = vmatpush3.bf16.msra.mxu1 %v1021_v20  ;;  %v1035_v20 = vld [vmem:[%s2609_s2] sm:$0xf] }
 0x404   :  { %v993_v21 = vmul.f32 0.04285942, %v933_v15  ;;  %v936_v23 = vadd.f32 %v1815_v25, %v2451_v22  ;;  %1959 = vmatprep.subr.bf16.mxu1 %v2091_v51  ;;  %vm977_vm7 = vcmp.gt.f32.partialorder %v933_v15, 0.0  ;;  %v2058_v25 = vld [vmem:[%s2611_s4 + $0x108] sm:$0xff]  }
 0x406   :  { %vm978_vm8 = vcmp.gt.f32.partialorder %v936_v23, 0.0  ;;  %v994_v24 = vmul.f32 0.04285942, %v936_v23  ;;  %v1816_v26 = vpop.f32.mrb[48].mxu0  ;;  %v1009_v30 = vsel %vm977_vm7, %v933_v15, %v993_v21  ;;  %v2057_v15 = vld [vmem:[%s2611_s4 + $0x148] sm:$0xff]   ;;  %v2059_v21 = vld [vmem:[%s2611_s4 + $0x150] sm:$0xff]  }
 0x407   :  { %v1817_v27 = vpop.f32.mrb[49].mxu0 }
 0x408   :  { %v1818_v28 = vadd.f32 %v1817_v27, %v1816_v26  ;;  %v1819_v29 = vpop.f32.mrb[50].mxu0  ;;  %v1010_v31 = vsel %vm978_vm8, %v936_v23, %v994_v24  ;;  %v2060_v23 = vld [vmem:[%s2611_s4 + $0x110] sm:$0xff]   ;;  %v2061_v24 = vld [vmem:[%s2611_s4 + $0x158] sm:$0xff]   ;;  %v2063_v27 = vld [vmem:[%s2611_s4 + $0x160] sm:$0xff]  }
 0x409   :  { %v1820_v32 = vpop.f32.mrb[51].mxu0  ;;  %v1022_v33 = vpack.c.bf16 %v1010_v31, %v1009_v30  ;;  %v2062_v26 = vld [vmem:[%s2611_s4 + $0x118] sm:$0xff]   ;;  %v2066_v30 = vld [vmem:[%s2611_s4 + $0x128] sm:$0xff]   ;;  %v2067_v31 = vld [vmem:[%s2611_s4 + $0x170] sm:$0xff]  }
 0x40a   :  { %v941_v38 = vadd.f32 %v1818_v28, %v2451_v22  ;;  %v1821_v34 = vadd.f32 %v1820_v32, %v1819_v29  ;;  %v2064_v28 = vld [vmem:[%s2611_s4 + $0x120] sm:$0xff]   ;;  %v2065_v29 = vld [vmem:[%s2611_s4 + $0x168] sm:$0xff]   ;;  %v2068_v32 = vld [vmem:[%s2611_s4 + $0x130] sm:$0xff]  }
 0x40b   :  { %1960 = vmatpush3.bf16.msra.mxu1 %v1022_v33  ;;  %v2069_v33 = vld [vmem:[%s2611_s4 + $0x178] sm:$0xff]  }
 0x40c   :  { %v995_v35 = vmul.f32 0.04285942, %v941_v38  ;;  %v944_v37 = vadd.f32 %v1821_v34, %v2451_v22  ;;  %1961 = vmatprep.subr.bf16.mxu1 %v2091_v51  ;;  %vm979_vm9 = vcmp.gt.f32.partialorder %v941_v38, 0.0  ;;  %v1085_v34 = vld [vmem:[%s2610_s3] sm:$0xf] }
 0x40e   :  { %vm980_vm10 = vcmp.gt.f32.partialorder %v944_v37, 0.0  ;;  %v996_v39 = vmul.f32 0.04285942, %v944_v37  ;;  %v1822_v0 = vpop.f32.mrb[52].mxu0  ;;  %v1011_v42 = vsel %vm979_vm9, %v941_v38, %v995_v35  ;;  %v2070_v38 = vld [vmem:[%s2611_s4 + $0x138] sm:$0xff]   ;;  %v2071_v35 = vld [vmem:[%s2613_s6] sm:$0xff]  }
 0x40f   :  { %v1823_v36 = vpop.f32.mrb[53].mxu0  ;;  %1974 = vmatpush3.bf16.msra.mxu0 %v2071_v35 }
 0x410   :  { %v1824_v40 = vadd.f32 %v1823_v36, %v1822_v0  ;;  %v1825_v41 = vpop.f32.mrb[54].mxu0  ;;  %v1012_v43 = vsel %vm980_vm10, %v944_v37, %v996_v39  ;;  %v2072_v37 = vld [vmem:[%s2613_s6 + $0x8] sm:$0xff]   ;;  %1975 = vmatprep.subr.bf16.mxu0 %v2091_v51  ;;  %v2073_v39 = vld [vmem:[%s2613_s6 + $0x10] sm:$0xff]   ;;  %v2074_v0 = vld [vmem:[%s2613_s6 + $0x18] sm:$0xff]  }
 0x411   :  { %v1826_v44 = vpop.f32.mrb[55].mxu0  ;;  %v1023_v45 = vpack.c.bf16 %v1012_v43, %v1011_v42  ;;  %v2075_v36 = vld [vmem:[%s2613_s6 + $0x20] sm:$0xff]  }
 0x412   :  { %v949_v46 = vadd.f32 %v1824_v40, %v2451_v22  ;;  %v1827_v47 = vadd.f32 %v1826_v44, %v1825_v41  ;;  %v2076_v40 = vld [vmem:[%s2613_s6 + $0x28] sm:$0xff]   ;;  %v2077_v41 = vld [vmem:[%s2613_s6 + $0x30] sm:$0xff]  }
 0x413   :  { %1962 = vmatpush3.bf16.msra.mxu1 %v1023_v45  ;;  %1976 = vmatpush3.bf16.msra.mxu0 %v2072_v37 }
 0x414   :  { %v997_v48 = vmul.f32 0.04285942, %v949_v46  ;;  %v952_v49 = vadd.f32 %v1827_v47, %v2451_v22  ;;  %1963 = vmatprep.subr.bf16.mxu1 %v2091_v51  ;;  %vm981_vm11 = vcmp.gt.f32.partialorder %v949_v46, 0.0  ;;  %1977 = vmatprep.subr.bf16.mxu0 %v2091_v51  ;;  %v2078_v47 = vld [vmem:[%s2613_s6 + $0x38] sm:$0xff]  }
 0x416   :  { %vm982_vm12 = vcmp.gt.f32.partialorder %v952_v49, 0.0  ;;  %v998_v50 = vmul.f32 0.04285942, %v952_v49  ;;  %v1828_v52 = vpop.f32.mrb[56].mxu0  ;;  %v1013_v56 = vsel %vm981_vm11, %v949_v46, %v997_v48  ;;  %v2079_v48 = vld [vmem:[%s2613_s6 + $0x40] sm:$0xff]  }
 0x417   :  { %v1829_v53 = vpop.f32.mrb[57].mxu0  ;;  %1978 = vmatpush3.bf16.msra.mxu0 %v2073_v39 }
 0x418   :  { %v1830_v54 = vadd.f32 %v1829_v53, %v1828_v52  ;;  %v1831_v55 = vpop.f32.mrb[58].mxu0  ;;  %v1014_v57 = vsel %vm982_vm12, %v952_v49, %v998_v50  ;;  %1979 = vmatprep.subr.bf16.mxu0 %v2091_v51  ;;  %v2080_v49 = vld [vmem:[%s2613_s6 + $0x48] sm:$0xff]   ;;  %v2081_v50 = vld [vmem:[%s2613_s6 + $0x50] sm:$0xff]   ;;  %v2082_v52 = vld [vmem:[%s2613_s6 + $0x58] sm:$0xff]  }
 0x419   :  { %v1832_v58 = vpop.f32.mrb[59].mxu0  ;;  %v1024_v59 = vpack.c.bf16 %v1014_v57, %v1013_v56  ;;  %v2083_v53 = vld [vmem:[%s2613_s6 + $0x60] sm:$0xff]  }
 0x41a   :  { %v957_v60 = vadd.f32 %v1830_v54, %v2451_v22  ;;  %v1833_v8 = vadd.f32 %v1832_v58, %v1831_v55  ;;  %v2084_v54 = vld [vmem:[%s2613_s6 + $0x68] sm:$0xff]   ;;  %v1627_v56 = vld [vmem:[%s2612_s5 + $0x2] ss:$0 sm:$0xff] }
 0x41b   :  { %1964 = vmatpush3.bf16.msra.mxu1 %v1024_v59  ;;  %1980 = vmatpush3.bf16.msra.mxu0 %v2074_v0 }
 0x41c   :  { %v999_v1 = vmul.f32 0.04285942, %v957_v60  ;;  %v960_v61 = vadd.f32 %v1833_v8, %v2451_v22  ;;  %1965 = vmatprep.subr.bf16.mxu1 %v2091_v51  ;;  %vm983_vm13 = vcmp.gt.f32.partialorder %v957_v60, 0.0  ;;  %1981 = vmatprep.subr.bf16.mxu0 %v2091_v51 }
 0x41e   :  { %vm984_vm14 = vcmp.gt.f32.partialorder %v960_v61, 0.0  ;;  %v1000_v62 = vmul.f32 0.04285942, %v960_v61  ;;  %v1834_v63 = vpop.f32.mrb[60].mxu0  ;;  %v1015_v10 = vsel %vm983_vm13, %v957_v60, %v999_v1 }
 0x41f   :  { %v1835_v2 = vpop.f32.mrb[61].mxu0  ;;  %1982 = vmatpush3.bf16.msra.mxu0 %v2075_v36 }
 0x420   :  { %v1836_v3 = vadd.f32 %v1835_v2, %v1834_v63  ;;  %v1837_v9 = vpop.f32.mrb[62].mxu0  ;;  %v1016_v4 = vsel %vm984_vm14, %v960_v61, %v1000_v62  ;;  %1983 = vmatprep.subr.bf16.mxu0 %v2091_v51  ;;  %v2085_v63 = vld [vmem:[%s2613_s6 + $0x70] sm:$0xff]   ;;  %v2086_v2 = vld [vmem:[%s2613_s6 + $0x78] sm:$0xff]  }
 0x421   :  { %v1838_v5 = vpop.f32.mrb[63].mxu0  ;;  %v1025_v11 = vpack.c.bf16 %v1016_v4, %v1015_v10 }
 0x422   :  { %v965_v12 = vadd.f32 %v1836_v3, %v2451_v22  ;;  %v1839_v6 = vadd.f32 %v1838_v5, %v1837_v9  ;;  %v1644_v3 = vld [vmem:[%s2614_s7] ss:$0 sm:$0xff] }
 0x423   :  { %1966 = vmatpush3.bf16.msra.mxu1 %v1025_v11  ;;  %1984 = vmatpush3.bf16.msra.mxu0 %v2076_v40 }
 0x424   :  { %v1001_v13 = vmul.f32 0.04285942, %v965_v12  ;;  %v968_v14 = vadd.f32 %v1839_v6, %v2451_v22  ;;  %1967 = vmatprep.subr.bf16.mxu1 %v2091_v51  ;;  %vm985_vm15 = vcmp.gt.f32.partialorder %v965_v12, 0.0  ;;  %v2056_v22 = vld [vmem:[%s2611_s4 + $0x100] sm:$0xff]   ;;  %1985 = vmatprep.subr.bf16.mxu0 %v2091_v51 }
 0x426   :  { %vm986_vm1 = vcmp.gt.f32.partialorder %v968_v14, 0.0  ;;  %v1002_v7 = vmul.f32 0.04285942, %v968_v14  ;;  %v1017_v16 = vsel %vm985_vm15, %v965_v12, %v1001_v13 }
 0x427   :  { %1986 = vmatpush3.bf16.msra.mxu0 %v2077_v41 }
 0x428   :  { %v1018_v17 = vsel %vm986_vm1, %v968_v14, %v1002_v7  ;;  %1987 = vmatprep.subr.bf16.mxu0 %v2091_v51 }
 0x429   :  { %v1026_v19 = vpack.c.bf16 %v1018_v17, %v1017_v16 }
 0x42b   :  { %1968 = vmatpush3.bf16.msra.mxu1 %v1026_v19  ;;  %1988 = vmatpush3.bf16.msra.mxu0 %v2078_v47 }
 0x42c   :  { %1849 = vmatprep.subr.bf16.mxu1 %v2055_v18 }
 0x42e   :  { %1970 = vmatmul.mubr.bf16.vlgmr.msra.gmra.mrb[32].mxu1 %v1035_v20 }
 0x42f   :  { %1850 = vmatpush3.bf16.msra.mxu1 %v2056_v22  ;;  %1252 = vmatprep.mubr.bf16.mxu1 %v1085_v34 }
 0x430   :  { %1851 = vmatprep.subr.bf16.mxu1 %v2057_v15 }
 0x433   :  { %1852 = vmatpush3.bf16.msra.mxu1 %v2058_v25 }
 0x434   :  { %1853 = vmatprep.subr.bf16.mxu1 %v2059_v21 }
 0x437   :  { %1854 = vmatpush3.bf16.msra.mxu1 %v2060_v23 }
 0x438   :  { %1855 = vmatprep.subr.bf16.mxu1 %v2061_v24 }
 0x43b   :  { %1856 = vmatpush3.bf16.msra.mxu1 %v2062_v26 }
 0x43c   :  { %1857 = vmatprep.subr.bf16.mxu1 %v2063_v27 }
 0x43f   :  { %1858 = vmatpush3.bf16.msra.mxu1 %v2064_v28 }
 0x440   :  { %1859 = vmatprep.subr.bf16.mxu1 %v2065_v29 }
 0x443   :  { %1860 = vmatpush3.bf16.msra.mxu1 %v2066_v30 }
 0x444   :  { %1861 = vmatprep.subr.bf16.mxu1 %v2067_v31 }
 0x447   :  { %1862 = vmatpush3.bf16.msra.mxu1 %v2068_v32 }
 0x448   :  { %1863 = vmatprep.subr.bf16.mxu1 %v2069_v33 }
 0x44b   :  { %1864 = vmatpush3.bf16.msra.mxu1 %v2070_v38 }
 0x44c   :  { %1993 = vmatprep.subr.bf16.mxu1 %v2091_v51 }
 0x501   :  { %v1078_v42 = vpop.f32.mrb[32].mxu1 }
 0x502   :  { %v1084_v43 = vpack.c.bf16 %v1078_v42, %v1078_v42  ;;  %v1971_v44 = vpop.f32.mrb[33].mxu1 }
 0x503   :  { %v1081_v45 = vpop.f32.mrb[34].mxu1 }
 0x504   :  { %v1972_v46 = vpop.f32.mrb[35].mxu1  ;;  %1253 = vmatmul.mubr.bf16.vlgmr.msra.gmra.mrb[36].mxu1 %v1084_v43 }
 0x505   :  { %2009 = vmatprep.mubr.msk.bf16.mxu1 %vm2092_vm0, %v2091_v51  ;;  %1994 = vmatpush3.bf16.msra.mxu1 %v2079_v48 }
 0x506   :  { %1995 = vmatprep.subr.bf16.mxu1 %v2091_v51 }
 0x509   :  { %1996 = vmatpush3.bf16.msra.mxu1 %v2080_v49 }
 0x50a   :  { %1997 = vmatprep.subr.bf16.mxu1 %v2091_v51 }
 0x50d   :  { %1998 = vmatpush3.bf16.msra.mxu1 %v2081_v50 }
 0x50e   :  { %1999 = vmatprep.subr.bf16.mxu1 %v2091_v51 }
 0x511   :  { %2000 = vmatpush3.bf16.msra.mxu1 %v2082_v52 }
 0x512   :  { %2001 = vmatprep.subr.bf16.mxu1 %v2091_v51 }
 0x515   :  { %2002 = vmatpush3.bf16.msra.mxu1 %v2083_v53 }
 0x516   :  { %2003 = vmatprep.subr.bf16.mxu1 %v2091_v51 }
 0x519   :  { %2004 = vmatpush3.bf16.msra.mxu1 %v2084_v54 }
 0x51a   :  { %2005 = vmatprep.subr.bf16.mxu1 %v2091_v51 }
 0x51d   :  { %2006 = vmatpush3.bf16.msra.mxu1 %v2085_v63 }
 0x51e   :  { %2007 = vmatprep.subr.bf16.mxu1 %v2091_v51  ;;  %v1669_v51 = vld [vmem:[%s2614_s7 + $0x1] ss:$0 sm:$0xff] }
 0x521   :  { %2008 = vmatpush3.bf16.msra.mxu1 %v2086_v2 }
 0x5d7   :  { %v1865_v55 = vpop.f32.mrb[36].mxu1 }
 0x5d8   :  { %v1866_v57 = vpop.f32.mrb[37].mxu1 }
 0x5d9   :  { %v1867_v58 = vadd.f32 %v1866_v57, %v1865_v55  ;;  %v1868_v59 = vpop.f32.mrb[38].mxu1 }
 0x5da   :  { %v1869_v60 = vpop.f32.mrb[39].mxu1 }
 0x5db   :  { %v1255_v8 = vadd.f32 %v1867_v58, %v1627_v56 }
 0x5dd   :  { %vm1260_vm0 = vcmp.gt.f32.partialorder %v1255_v8, 0.0  ;;  %v1261_v1 = vmul.f32 0.04285942, %v1255_v8 }
 0x5df   :  { %v1262_v61 = vsel %vm1260_vm0, %v1255_v8, %v1261_v1 }
 0x5e0   :  { %v1263_v62 = vpack.c.bf16 %v1262_v61, %v1262_v61 }
 0x5e2   :  { %1990 = vmatmul.mubr.bf16.vlgmr.msra.gmra.mrb[64].mxu0 %v1263_v62 }
 0x6b5   :  { %v1367_v9 = vpop.f32.mrb[64].mxu0 }
 0x6b6   :  { %v1368_v10 = vadd.f32 %v1644_v3, %v1367_v9  ;;  %v1991_v4 = vpop.f32.mrb[65].mxu0 }
 0x6b7   :  { %v1370_v5 = vpop.f32.mrb[66].mxu0 }
 0x6b8   :  { %vm1373_vm2 = vcmp.gt.f32.partialorder %v1368_v10, 0.0  ;;  %v1374_v11 = vmul.f32 0.04285942, %v1368_v10  ;;  %v1992_v12 = vpop.f32.mrb[67].mxu0 }
 0x6ba   :  { %v1375_v6 = vsel %vm1373_vm2, %v1368_v10, %v1374_v11 }
 0x6bb   :  { %v1376_v13 = vpack.c.bf16 %v1375_v6, %v1375_v6 }
 0x6bd   :  { %2010 = vmatmul.mubr.bf16.vlgmr.msra.gmra.mrb[40].mxu1 %v1376_v13 }
 0x790   :  { %v1481_v14 = vpop.f32.mrb[40].mxu1 }
 0x791   :  { %v1482_v7 = vadd.f32 %v1669_v51, %v1481_v14  ;;  %v2011_v16 = vpop.f32.mrb[41].mxu1 }
 0x792   :  { %v1484_v17 = vpop.f32.mrb[42].mxu1 }
 0x793   :  { %1487 = vst [vmem:[%s2615_s8] sm:$0xff] %v1482_v7  ;;  %v2012_v18 = vpop.f32.mrb[43].mxu1 }
 0x794   :  { %1492 = vsyncmov [#allocation5] }
 0x797   :  { %s1493_s22 = vpop.sfrf %1492 }
 0x798   :  { %p1678_p0 = scmp.ne.s32.totalorder %s1493_s22, 0 }
 0x79a   :  { %1497 = shalt.err (%p1678_p0)  }
 0x79b   :  { %1499 = vsyncmov [#allocation5 + $0x1] }
 0x79e   :  { %s1500_s23 = vpop.sfrf %1499 }
 0x79f   :  { %p1679_p1 = scmp.ne.s32.totalorder %s1500_s23, 0 }
 0x7a1   :  { %1504 = shalt.err (%p1679_p1)  }

</bundles_post_ra>
